<compile_context>
chip_gen: v5e
topology: v5e:2x2
jax: 0.10.0
libtpu: 0.0.40
codegen_flags: <defaults>
</compile_context>

<pallas_src>
import math
import functools

import jax
import jax.numpy as jnp
from jax.experimental import pallas as pl
from jax.experimental.pallas import tpu as pltpu


def _cosine_cutoff_kernel(d_ref, o_ref, *, cutoff_lower, cutoff_upper):
    d = d_ref[...]
    if cutoff_lower > 0:
        # 0.5*(cos(pi*(2*(d-lo)/(hi-lo)+1))+1) == 0.5*(1 - cos((d-lo)*2*pi/(hi-lo)))
        scale = 2.0 * math.pi / (cutoff_upper - cutoff_lower)
        cut = 0.5 * (1.0 - jnp.cos((d - cutoff_lower) * scale))
        mask = (d > cutoff_lower) & (d < cutoff_upper)
    else:
        cut = 0.5 * (jnp.cos(d * (math.pi / cutoff_upper)) + 1.0)
        mask = d < cutoff_upper
    o_ref[...] = jnp.where(mask, cut, 0.0).astype(o_ref.dtype)


def cosine_cutoff(distances, cutoff_lower=0.0, cutoff_upper=5.0, *,
                  block_rows=512, lane_width=1024):
    """Elementwise cosine cutoff; accepts any input shape."""
    orig_shape = distances.shape
    dtype = distances.dtype
    flat = distances.reshape(-1)
    total = flat.size

    kernel = functools.partial(
        _cosine_cutoff_kernel,
        cutoff_lower=float(cutoff_lower),
        cutoff_upper=float(cutoff_upper),
    )

    itemsize = jnp.dtype(dtype).itemsize
    small_limit_bytes = 2 * 1024 * 1024

    if total * itemsize <= small_limit_bytes:
        # Fast path: one whole-array block, no grid-loop / pipeline overhead.
        lanes = 128
        rows = max(1, -(-total // lanes))
        padded = rows * lanes
        if padded != total:
            flat = jnp.pad(flat, (0, padded - total))
        d2 = flat.reshape(rows, lanes)
        out = pl.pallas_call(
            kernel,
            out_shape=jax.ShapeDtypeStruct((rows, lanes), dtype),
            grid_spec=pltpu.PrefetchScalarGridSpec(
                num_scalar_prefetch=0,
                grid=(1,),
                in_specs=[pl.BlockSpec((rows, lanes), lambda i: (0, 0))],
                out_specs=pl.BlockSpec((rows, lanes), lambda i: (0, 0)),
            ),
            compiler_params=pltpu.CompilerParams(
                dimension_semantics=("arbitrary",),
            ),
        )(d2)
    else:
        # Large path: lane-dense slab with big tiles, padded so every block
        # is full (no partial last block, no masked stores).
        lanes = lane_width
        block_elems = block_rows * lanes
        n_blocks = -(-total // block_elems)
        padded = n_blocks * block_elems
        if padded != total:
            flat = jnp.pad(flat, (0, padded - total))
        d2 = flat.reshape(n_blocks * block_rows, lanes)
        out = pl.pallas_call(
            kernel,
            out_shape=jax.ShapeDtypeStruct(d2.shape, dtype),
            grid_spec=pltpu.PrefetchScalarGridSpec(
                num_scalar_prefetch=0,
                grid=(n_blocks,),
                in_specs=[pl.BlockSpec((block_rows, lanes), lambda i: (i, 0))],
                out_specs=pl.BlockSpec((block_rows, lanes), lambda i: (i, 0)),
            ),
            compiler_params=pltpu.CompilerParams(
                dimension_semantics=("parallel",),  # shards across v7x's 2 TCs
            ),
        )(d2)

    return out.reshape(-1)[:total].reshape(orig_shape)


def _reference(distances, cutoff_lower=0.0, cutoff_upper=5.0):
    d = distances
    if cutoff_lower > 0:
        c = 0.5 * (jnp.cos(math.pi * (2.0 * (d - cutoff_lower) /
                                      (cutoff_upper - cutoff_lower) + 1.0)) + 1.0)
        c = c * (d < cutoff_upper).astype(d.dtype)
        c = c * (d > cutoff_lower).astype(d.dtype)
        return c
    c = 0.5 * (jnp.cos(d * math.pi / cutoff_upper) + 1.0)
    c = c * (d < cutoff_upper).astype(d.dtype)
    return c


if __name__ == "__main__":
    key = jax.random.PRNGKey(0)
    k0, k1 = jax.random.split(key)

    # Small pairwise-distance matrix: 16 atoms x 256 neighbors.
    distances = jax.random.uniform(k0, (16, 256), dtype=jnp.float32,
                                   minval=0.0, maxval=7.0)
    # Non-lane-friendly shape to exercise the pad/flatten path.
    distances_odd = jax.random.uniform(k1, (7, 33), dtype=jnp.float32,
                                       minval=0.0, maxval=7.0)

    # Case 1: cutoff_lower == 0 (default branch)
    out0 = cosine_cutoff(distances, cutoff_lower=0.0, cutoff_upper=5.0)
    ref0 = _reference(distances, cutoff_lower=0.0, cutoff_upper=5.0)

    # Case 2: cutoff_lower > 0 branch
    out1 = cosine_cutoff(distances, cutoff_lower=1.0, cutoff_upper=5.0)
    ref1 = _reference(distances, cutoff_lower=1.0, cutoff_upper=5.0)

    # Case 3: odd shape, both branches
    out2 = cosine_cutoff(distances_odd, cutoff_lower=0.0, cutoff_upper=5.0)
    ref2 = _reference(distances_odd, cutoff_lower=0.0, cutoff_upper=5.0)
    out3 = cosine_cutoff(distances_odd, cutoff_lower=1.0, cutoff_upper=5.0)
    ref3 = _reference(distances_odd, cutoff_lower=1.0, cutoff_upper=5.0)

    jax.block_until_ready((out0, out1, out2, out3))

    assert out0.shape == distances.shape and out0.dtype == distances.dtype
    assert out2.shape == distances_odd.shape
    assert jnp.allclose(out0, ref0, atol=1e-5, rtol=1e-5)
    assert jnp.allclose(out1, ref1, atol=1e-5, rtol=1e-5)
    assert jnp.allclose(out2, ref2, atol=1e-5, rtol=1e-5)
    assert jnp.allclose(out3, ref3, atol=1e-5, rtol=1e-5)

    print("KERNEL_OK")
</pallas_src>

<mosaic_0001>
module attributes {stable_mosaic.version = 11 : i64} {
  func.func @_cosine_cutoff_kernel(%arg0: i32, %arg1: memref<32x128xf32, #tpu.memory_space<vmem>>, %arg2: memref<32x128xf32, #tpu.memory_space<vmem>>) attributes {dimension_semantics = [#tpu.dimension_semantics<arbitrary>], iteration_bounds = array<i64: 1>, scalar_prefetch = 0 : i64, scratch_operands = 0 : i64, tpu.core_type = #tpu.core_type<tc>, window_params = [{pipeline_mode = #tpu.pipeline_mode<synchronous>, transform_indices = @transform_0, window_bounds = array<i64: 32, 128>}, {pipeline_mode = #tpu.pipeline_mode<synchronous>, transform_indices = @transform_1, window_bounds = array<i64: 32, 128>}]} {
    %c0 = arith.constant 0 : index
    %c0_0 = arith.constant 0 : index
    %0 = vector.load %arg1[%c0, %c0_0] : memref<32x128xf32, #tpu.memory_space<vmem>>, vector<32x128xf32>
    %cst = arith.constant 0.628318548 : f32
    %1 = vector.broadcast %cst : f32 to vector<32x128xf32>
    %2 = arith.mulf %0, %1 : vector<32x128xf32>
    %3 = math.cos %2 : vector<32x128xf32>
    %cst_1 = arith.constant 1.000000e+00 : f32
    %4 = vector.broadcast %cst_1 : f32 to vector<32x128xf32>
    %5 = arith.addf %3, %4 : vector<32x128xf32>
    %cst_2 = arith.constant 5.000000e-01 : f32
    %6 = vector.broadcast %cst_2 : f32 to vector<32x128xf32>
    %7 = arith.mulf %6, %5 : vector<32x128xf32>
    %cst_3 = arith.constant 5.000000e+00 : f32
    %8 = vector.broadcast %cst_3 : f32 to vector<32x128xf32>
    %9 = arith.cmpf olt, %0, %8 : vector<32x128xf32>
    %cst_4 = arith.constant 0.000000e+00 : f32
    %10 = vector.broadcast %cst_4 : f32 to vector<32x128xf32>
    %11 = arith.select %9, %7, %10 : vector<32x128xi1>, vector<32x128xf32>
    %c0_5 = arith.constant 0 : index
    %c0_6 = arith.constant 0 : index
    %12 = vector.load %arg2[%c0_5, %c0_6] : memref<32x128xf32, #tpu.memory_space<vmem>>, vector<32x128xf32>
    tpu.vector_store %arg2[%c0_5, %c0_6], %11 {strides = array<i32>} : memref<32x128xf32, #tpu.memory_space<vmem>>, vector<32x128xf32>,
    return
  }
  func.func @transform_0(%arg0: i32) -> (i32, i32) {
    %c0_i32 = arith.constant 0 : i32
    %c0_i32_0 = arith.constant 0 : i32
    %c0_i32_1 = arith.constant 0 : i32
    return %c0_i32, %c0_i32_0 : i32, i32
  }
  func.func @transform_1(%arg0: i32) -> (i32, i32) {
    %c0_i32 = arith.constant 0 : i32
    %c0_i32_0 = arith.constant 0 : i32
    %c0_i32_1 = arith.constant 0 : i32
    return %c0_i32, %c0_i32_0 : i32, i32
  }
}

</mosaic_0001>

<bundles_post_ra>
// kernel: tpu_custom_call.1
= control target key start
LH: loop header
LB: loop body
LE: loop exit
PB: predicated region body
PF: predicated region fallthrough
CT: control target
= control target key end

     0   :  { %6 = vsyncpa [#allocation3], 0  ;;  %s1238_s0 = inlined_call_operand.hbm [shape: f32[32,128], index: 0, kind: input, shape index: {}]   ;;  %s1239_s1 = inlined_call_operand.hbm [shape: f32[32,128], index: 1, kind: output, shape index: {}]  }
   0x1   :  { %7 = vsyncpa [#allocation4], 0  ;;  %s12_s8 = sshll.u32 %s1238_s0, 4  ;;  %s766_s9 = smov [#allocation2]   ;;  %s13_s8 = int_to_ptr.hbm [resolvable:$true] %s12_s8 }
   0x2   :  { %s14_s10 = sshll.u32 %s766_s9, 4  ;;  %s767_s11 = smov 128   ;;  %s15_s10 = int_to_ptr.vmem [resolvable:$true] %s14_s10 }
   0x3   :  { %s768_s12 = smov 8  }
   0x4   :  { %20 = dma.hbm_to_vmem [thread:$0]  %s13_s8, 512, %s15_s10, [#allocation3], %s767_s11, %s767_s11, %s768_s12  }
   0x5   :  { %762 = dma.done.wait [#allocation3], 512  }
   0x6   :  { %763 = vsyncadd [#allocation3], 4294966784  ;;  %v25_v0 = vld [vmem:[#allocation2] sm:$0xff]  ;;  %v26_v1 = vld [vmem:[#allocation2 + $0x8] sm:$0xff]  ;;  %v769_v31 = vmov 683565275  }
   0x7   :  { %v27_v2 = vld [vmem:[#allocation2 + $0x10] sm:$0xff]  ;;  %v793_v3 = vmul.f32 0.62831855, %v25_v0  ;;  %v795_v4 = vmul.f32 0.62831855, %v26_v1  ;;  %s776_s0 = smov [#allocation5]  }
   0x8   :  { %v797_v5 = vmul.f32 0.62831855, %v27_v2  ;;  %v770_v33 = vmov 2475754826   ;;  %v771_v35 = vmov 2131351028  }
   0x9   :  { %v33_v6 = vand.u32 2147483647, %v793_v3  ;;  %v36_v7 = vand.u32 2139095040, %v793_v3  ;;  %v187_v8 = vand.u32 2147483647, %v795_v4  ;;  %v190_v9 = vand.u32 2139095040, %v795_v4 }
   0xa   :  { %v344_v10 = vand.u32 2139095040, %v797_v5  ;;  %v772_v37 = vmov 2102212464   ;;  %v773_v39 = vmov 920167782   ;;  %s673_s13 = sshll.u32 %s776_s0, 4  ;;  %s674_s13 = int_to_ptr.vmem [resolvable:$true] %s673_s13 }
   0xb   :  { %v37_v11 = vshrl.u32 %v36_v7, 23  ;;  %v40_v12 = vand.u32 8388607, %v33_v6  ;;  %v191_v13 = vshrl.u32 %v190_v9, 23  ;;  %v194_v14 = vand.u32 8388607, %v187_v8 }
   0xc   :  { %v345_v18 = vshrl.u32 %v344_v10, 23  ;;  %v774_v48 = vmov 1326507024   ;;  %s675_s16 = sshll.u32 %s1239_s1, 4  ;;  %s676_s16 = int_to_ptr.hbm [resolvable:$true] %s675_s16 }
   0xd   :  { %v688_v15 = vadd.s32 4294967169, %v37_v11  ;;  %v41_v16 = vor.u32 8388608, %v40_v12  ;;  %v691_v17 = vadd.s32 4294967169, %v191_v13  ;;  %v195_v20 = vor.u32 8388608, %v194_v14 }
   0xe   :  { %v694_v24 = vadd.s32 4294967169, %v345_v18 }
   0xf   :  { %v43_v19 = vadd.s32 1, %v688_v15  ;;  %v197_v21 = vadd.s32 1, %v691_v17  ;;  %v808_v23 = vshll.u32 %v41_v16, 8  ;;  %v814_v29 = vshll.u32 %v195_v20, 8 }
  0x10   :  { %v822_v42 = vadd.s32 1, %v694_v24 }
  0x11   :  { %vm44_vm0 = vcmp.gt.s32.totalorder %v43_v19, 0  ;;  %vm198_vm1 = vcmp.gt.s32.totalorder %v197_v21, 0  ;;  %v82_v41 = vand.u32 65535, %v808_v23  ;;  %v83_v46 = vshrl.u32 %v808_v23, 16 }
  0x12   :  { %v45_v22 = vsel %vm44_vm0, %v43_v19, 0  ;;  %v199_v26 = vsel %vm198_vm1, %v197_v21, 0  ;;  %vm352_vm15 = vcmp.gt.s32.totalorder %v822_v42, 0 }
  0x13   :  { %v47_v25 = vand.u32 31, %v45_v22  ;;  %v810_v27 = vshrl.u32 %v45_v22, 5  ;;  %v812_v28 = vand.u32 31, %v199_v26  ;;  %v842_v59 = vshrl.u32 %v199_v26, 5 }
  0x15   :  { %v48_v30 = vsub.s32 32, %v47_v25  ;;  %v50_v32 = vshll.u32 %v769_v31, %v47_v25  ;;  %v53_v34 = vshll.u32 %v770_v33, %v47_v25  ;;  %v56_v36 = vshll.u32 %v771_v35, %v47_v25 }
  0x16   :  { %v59_v38 = vshll.u32 %v772_v37, %v47_v25  ;;  %v62_v40 = vshll.u32 %v773_v39, %v47_v25  ;;  %vm65_vm2 = vcmp.lt.s32.totalorder %v810_v27, 1  ;;  %vm68_vm3 = vcmp.lt.s32.totalorder %v810_v27, 4 }
  0x17   :  { %v51_v43 = vshrl.u32 %v770_v33, %v48_v30  ;;  %v54_v44 = vshrl.u32 %v771_v35, %v48_v30  ;;  %v57_v45 = vshrl.u32 %v772_v37, %v48_v30  ;;  %v60_v47 = vshrl.u32 %v773_v39, %v48_v30 }
  0x18   :  { %v63_v49 = vshrl.u32 %v774_v48, %v48_v30  ;;  %v833_v53 = vsub.s32 32, %v812_v28  ;;  %v49_v54 = vshrl.u32 %v769_v31, %v48_v30  ;;  %vm67_vm4 = vcmp.lt.s32.totalorder %v810_v27, 3 }
  0x19   :  { %v52_v50 = vor.u32 %v51_v43, %v50_v32  ;;  %v55_v51 = vor.u32 %v54_v44, %v53_v34  ;;  %v58_v52 = vor.u32 %v57_v45, %v56_v36  ;;  %v61_v55 = vor.u32 %v60_v47, %v59_v38 }
  0x1a   :  { %v64_v56 = vor.u32 %v63_v49, %v62_v40  ;;  %vm66_vm5 = vcmp.lt.s32.totalorder %v810_v27, 2  ;;  %v204_v62 = vshll.u32 %v769_v31, %v812_v28  ;;  %v207_v63 = vshll.u32 %v770_v33, %v812_v28 }
  0x1b   :  { %v73_v57 = vsel %vm65_vm2, %v52_v50, %v55_v51  ;;  %v77_v58 = vsel %vm65_vm2, %v55_v51, %v58_v52  ;;  %v74_v60 = vsel %vm68_vm3, %v61_v55, 920167782  ;;  %v70_v0 = vsel %vm68_vm3, %v58_v52, 2102212464 }
  0x1c   :  { %v78_v61 = vsel %vm68_vm3, %v64_v56, 1326507024  ;;  %v75_v1 = vsel %vm67_vm4, %v58_v52, %v74_v60  ;;  %v205_v7 = vshrl.u32 %v770_v33, %v833_v53  ;;  %v69_v9 = vsel %vm65_vm2, %v49_v54, %v52_v50 }
  0x1d   :  { %v79_v2 = vsel %vm67_vm4, %v61_v55, %v78_v61  ;;  %v76_v10 = vsel %vm66_vm5, %v73_v57, %v75_v1  ;;  %v208_v12 = vshrl.u32 %v771_v35, %v833_v53  ;;  %v71_v17 = vsel %vm67_vm4, %v55_v51, %v70_v0 }
  0x1e   :  { %v80_v11 = vsel %vm66_vm5, %v77_v58, %v79_v2  ;;  %v106_v15 = vand.u32 65535, %v76_v10  ;;  %v107_v16 = vshrl.u32 %v76_v10, 16  ;;  %v870_v18 = vor.u32 %v205_v7, %v204_v62 }
  0x1f   :  { %v84_v13 = vand.u32 65535, %v80_v11  ;;  %v85_v14 = vshrl.u32 %v80_v11, 16  ;;  %v872_v19 = vor.u32 %v208_v12, %v207_v63  ;;  %v210_v20 = vshll.u32 %v771_v35, %v812_v28 }
  0x20   :  { %v211_v25 = vshrl.u32 %v772_v37, %v833_v53  ;;  %v108_v30 = vmul.u32 %v106_v15, %v82_v41  ;;  %v109_v32 = vmul.u32 %v107_v16, %v82_v41  ;;  %v110_v34 = vmul.u32 %v106_v15, %v83_v46 }
  0x21   :  { %v86_v21 = vmul.u32 %v84_v13, %v82_v41  ;;  %v87_v22 = vmul.u32 %v85_v14, %v82_v41  ;;  %v88_v24 = vmul.u32 %v84_v13, %v83_v46  ;;  %v89_v26 = vmul.u32 %v85_v14, %v83_v46 }
  0x22   :  { %v111_v43 = vmul.u32 %v107_v16, %v83_v46  ;;  %v112_v45 = vshll.u32 %v109_v32, 16  ;;  %v113_v47 = vshrl.u32 %v109_v32, 16  ;;  %v114_v49 = vshll.u32 %v110_v34, 16 }
  0x23   :  { %v90_v36 = vshll.u32 %v87_v22, 16  ;;  %v91_v38 = vshrl.u32 %v87_v22, 16  ;;  %v92_v40 = vshll.u32 %v88_v24, 16  ;;  %v93_v44 = vshrl.u32 %v88_v24, 16 }
  0x24   :  { %v115_v51 = vshrl.u32 %v110_v34, 16  ;;  %v213_v52 = vshll.u32 %v772_v37, %v812_v28  ;;  %v775_v54 = vmov 0   ;;  %vm116_vm7 = vc.u32 %v108_v30, %v112_v45 }
  0x25   :  { %vm94_vm6 = vc.u32 %v86_v21, %v90_v36  ;;  %v96_v50 = vadd.s32 %v90_v36, %v86_v21  ;;  %v118_v41 = vadd.s32 %v112_v45, %v108_v30  ;;  %v214_v56 = vshrl.u32 %v773_v39, %v833_v53 }
  0x26   :  { %v95_v55 = vsel %vm94_vm6, 1, %v775_v54  ;;  %v117_v46 = vsel %vm116_vm7, 1, %v775_v54  ;;  %v216_v58 = vshll.u32 %v773_v39, %v812_v28  ;;  %v212_v62 = vor.u32 %v211_v25, %v210_v20 }
  0x27   :  { %v97_v57 = vadd.s32 %v95_v55, %v89_v26  ;;  %vm98_vm8 = vc.u32 %v96_v50, %v92_v40  ;;  %v119_v61 = vadd.s32 %v117_v46, %v111_v43  ;;  %vm120_vm9 = vc.u32 %v118_v41, %v114_v49 }
  0x28   :  { %v99_v60 = vsel %vm98_vm8, 1, %v775_v54  ;;  %v121_v0 = vsel %vm120_vm9, 1, %v775_v54  ;;  %v215_v1 = vor.u32 %v214_v56, %v213_v52  ;;  %v217_v2 = vshrl.u32 %v774_v48, %v833_v53 }
  0x29   :  { %v101_v63 = vadd.s32 %v99_v60, %v97_v57  ;;  %v890_v7 = vadd.s32 %v118_v41, %v114_v49  ;;  %v123_v10 = vadd.s32 %v121_v0, %v119_v61  ;;  %vm219_vm10 = vcmp.lt.s32.totalorder %v842_v59, 1 }
  0x2a   :  { %vm221_vm11 = vcmp.lt.s32.totalorder %v842_v59, 3  ;;  %v218_v11 = vor.u32 %v217_v2, %v216_v58  ;;  %vm220_vm12 = vcmp.lt.s32.totalorder %v842_v59, 2  ;;  %vm222_vm13 = vcmp.lt.s32.totalorder %v842_v59, 4 }
  0x2b   :  { %v102_v28 = vadd.s32 %v101_v63, %v91_v38  ;;  %v72_v12 = vsel %vm66_vm5, %v69_v9, %v71_v17  ;;  %v124_v13 = vadd.s32 %v123_v10, %v113_v47  ;;  %v227_v14 = vsel %vm219_vm10, %v870_v18, %v872_v19 }
  0x2c   :  { %v228_v15 = vsel %vm222_vm13, %v215_v1, 920167782  ;;  %v231_v21 = vsel %vm219_vm10, %v872_v19, %v212_v62  ;;  %v236_v27 = vand.u32 65535, %v814_v29  ;;  %v232_v22 = vsel %vm222_vm13, %v218_v11, 1326507024 }
  0x2d   :  { %v904_v16 = vadd.s32 %v102_v28, %v93_v44  ;;  %v229_v20 = vsel %vm221_vm11, %v212_v62, %v228_v15  ;;  %v125_v9 = vadd.s32 %v124_v13, %v115_v51  ;;  %v237_v24 = vshrl.u32 %v814_v29, 16 }
  0x2e   :  { %v230_v17 = vsel %vm220_vm12, %v227_v14, %v229_v20  ;;  %v126_v25 = vmul.u32 %v808_v23, %v72_v12  ;;  %v233_v26 = vsel %vm221_vm11, %v215_v1, %v232_v22  ;;  %v203_v38 = vshrl.u32 %v769_v31, %v833_v53 }
  0x2f   :  { %vm128_vm14 = vc.u32 %v904_v16, %v890_v7  ;;  %v260_v30 = vand.u32 65535, %v230_v17  ;;  %v129_v32 = vadd.s32 1, %v125_v9  ;;  %v234_v34 = vsel %vm220_vm12, %v231_v21, %v233_v26 }
  0x30   :  { %v261_v36 = vshrl.u32 %v230_v17, 16  ;;  %v238_v40 = vand.u32 65535, %v234_v34  ;;  %v239_v43 = vshrl.u32 %v234_v34, 16  ;;  %v224_v44 = vsel %vm222_vm13, %v212_v62, 2102212464 }
  0x31   :  { %v130_v23 = vsel %vm128_vm14, %v129_v32, %v125_v9  ;;  %v264_v47 = vmul.u32 %v260_v30, %v237_v24  ;;  %v262_v52 = vmul.u32 %v260_v30, %v236_v27  ;;  %v353_v56 = vsel %vm352_vm15, %v822_v42, 0 }
  0x32   :  { %v263_v45 = vmul.u32 %v261_v36, %v236_v27  ;;  %v131_v49 = vadd.s32 %v130_v23, %v126_v25  ;;  %v240_v50 = vmul.u32 %v238_v40, %v236_v27  ;;  %v241_v51 = vmul.u32 %v239_v43, %v236_v27 }
  0x33   :  { %v242_v55 = vmul.u32 %v238_v40, %v237_v24  ;;  %v223_v53 = vsel %vm219_vm10, %v203_v38, %v870_v18  ;;  %v243_v46 = vmul.u32 %v239_v43, %v237_v24  ;;  %v225_v60 = vsel %vm221_vm11, %v872_v19, %v224_v44 }
  0x34   :  { %v266_v41 = vshll.u32 %v263_v45, 16  ;;  %v132_v57 = vadd.s32 536870912, %v131_v49  ;;  %v244_v58 = vshll.u32 %v241_v51, 16  ;;  %v265_v62 = vmul.u32 %v261_v36, %v237_v24 }
  0x35   :  { %v246_v61 = vshll.u32 %v242_v55, 16  ;;  %v268_v63 = vshll.u32 %v264_v47, 16  ;;  %v245_v42 = vshrl.u32 %v241_v51, 16  ;;  %v267_v12 = vshrl.u32 %v263_v45, 16 }
  0x36   :  { %v936_v0 = vshrl.u32 %v132_v57, 30  ;;  %vm248_vm0 = vc.u32 %v240_v50, %v244_v58  ;;  %v250_v1 = vadd.s32 %v244_v58, %v240_v50  ;;  %vm270_vm1 = vc.u32 %v262_v52, %v266_v41 }
  0x37   :  { %v249_v2 = vsel %vm248_vm0, 1, %v775_v54  ;;  %v271_v10 = vsel %vm270_vm1, 1, %v775_v54  ;;  %v272_v18 = vadd.s32 %v266_v41, %v262_v52  ;;  %v355_v14 = vand.u32 31, %v353_v56 }
  0x38   :  { %v134_v28 = vshll.u32 %v936_v0, 30  ;;  %v251_v11 = vadd.s32 %v249_v2, %v243_v46  ;;  %vm252_vm2 = vc.u32 %v250_v1, %v246_v61  ;;  %v273_v13 = vadd.s32 %v271_v10, %v265_v62 }
  0x39   :  { %v253_v19 = vsel %vm252_vm2, 1, %v775_v54  ;;  %vm274_vm3 = vc.u32 %v272_v18, %v268_v63  ;;  %v247_v20 = vshrl.u32 %v242_v55, 16  ;;  %v269_v9 = vshrl.u32 %v264_v47, 16 }
  0x3a   :  { %v942_v15 = vsub.s32 %v131_v49, %v134_v28  ;;  %v255_v21 = vadd.s32 %v253_v19, %v251_v11  ;;  %v275_v27 = vsel %vm274_vm3, 1, %v775_v54  ;;  %v947_v25 = vadd.s32 %v272_v18, %v268_v63 }
  0x3b   :  { %v277_v17 = vadd.s32 %v275_v27, %v273_v13  ;;  %v226_v26 = vsel %vm220_vm12, %v223_v53, %v225_v60  ;;  %v951_v32 = vsub.s32 32, %v355_v14  ;;  %v341_v43 = vand.u32 2147483647, %v797_v5 }
  0x3c   :  { %vm136_vm4 = vcmp.lt.s32.totalorder %v942_v15, 0  ;;  %v137_v22 = vsub.s32 0, %v942_v15  ;;  %v256_v24 = vadd.s32 %v255_v21, %v245_v42  ;;  %v280_v23 = vmul.u32 %v814_v29, %v226_v26 }
  0x3d   :  { %v278_v30 = vadd.s32 %v277_v17, %v267_v12  ;;  %v358_v44 = vshll.u32 %v769_v31, %v355_v14  ;;  %v361_v59 = vshll.u32 %v770_v33, %v355_v14  ;;  %v359_v47 = vshrl.u32 %v770_v33, %v951_v32 }
  0x3e   :  { %v138_v34 = vsel %vm136_vm4, %v137_v22, %v942_v15  ;;  %v954_v36 = vadd.s32 %v256_v24, %v247_v20  ;;  %v367_v49 = vshll.u32 %v772_v37, %v355_v14  ;;  %v368_v50 = vshrl.u32 %v773_v39, %v951_v32 }
  0x3f   :  { %v139_v38 = vclz %v138_v34  ;;  %v279_v40 = vadd.s32 %v278_v30, %v269_v9  ;;  %v362_v29 = vshrl.u32 %v771_v35, %v951_v32  ;;  %v364_v52 = vshll.u32 %v771_v35, %v355_v14 }
  0x40   :  { %vm282_vm5 = vc.u32 %v954_v36, %v947_v25  ;;  %v365_v55 = vshrl.u32 %v772_v37, %v951_v32  ;;  %v972_v57 = vshrl.u32 %v353_v56, 5  ;;  %v348_v46 = vand.u32 8388607, %v341_v43 }
  0x41   :  { %v283_v45 = vadd.s32 1, %v279_v40  ;;  %v689_v51 = vadd.s32 4294967294, %v139_v38  ;;  %v370_v58 = vshll.u32 %v773_v39, %v355_v14  ;;  %v371_v60 = vshrl.u32 %v774_v48, %v951_v32 }
  0x42   :  { %v979_v61 = vor.u32 %v359_v47, %v358_v44  ;;  %v369_v62 = vor.u32 %v368_v50, %v367_v49  ;;  %v981_v1 = vor.u32 %v362_v29, %v361_v59  ;;  %v983_v42 = vor.u32 %v365_v55, %v364_v52 }
  0x43   :  { %v284_v41 = vsel %vm282_vm5, %v283_v45, %v279_v40  ;;  %vm690_vm6 = vcmp.lt.s32.totalorder %v689_v51, 0  ;;  %vm373_vm7 = vcmp.lt.s32.totalorder %v972_v57, 1  ;;  %vm375_vm8 = vcmp.lt.s32.totalorder %v972_v57, 3 }
  0x44   :  { %v285_v53 = vadd.s32 %v284_v41, %v280_v23  ;;  %vm376_vm9 = vcmp.lt.s32.totalorder %v972_v57, 4  ;;  %v349_v2 = vor.u32 8388608, %v348_v46  ;;  %v372_v10 = vor.u32 %v371_v60, %v370_v58 }
  0x45   :  { %v142_v18 = vsel %vm690_vm6, 0, %v689_v51  ;;  %v382_v28 = vsel %vm376_vm9, %v369_v62, 920167782  ;;  %vm374_vm10 = vcmp.lt.s32.totalorder %v972_v57, 2  ;;  %v381_v12 = vsel %vm373_vm7, %v979_v61, %v981_v1 }
  0x46   :  { %v286_v63 = vadd.s32 536870912, %v285_v53  ;;  %v383_v19 = vsel %vm375_vm8, %v983_v42, %v382_v28  ;;  %v385_v13 = vsel %vm373_vm7, %v981_v1, %v983_v42  ;;  %v147_v14 = vsub.s32 4294967266, %v142_v18 }
  0x47   :  { %v386_v21 = vsel %vm376_vm9, %v372_v10, 1326507024  ;;  %v1007_v27 = vshll.u32 %v349_v2, 8  ;;  %v127_v9 = vadd.s32 %v890_v7, %v904_v16  ;;  %v384_v17 = vsel %vm374_vm10, %v381_v12, %v383_v19 }
  0x48   :  { %v988_v56 = vshrl.u32 %v286_v63, 30  ;;  %v387_v22 = vsel %vm375_vm8, %v369_v62, %v386_v21  ;;  %v143_v34 = vsub.s32 32, %v142_v18  ;;  %v148_v44 = vadd.s32 127, %v147_v14  ;;  %v1023_v14 = vld [vmem:[#allocation2 + $0x18] sm:$0xff] }
  0x49   :  { %v388_v26 = vsel %vm374_vm10, %v385_v13, %v387_v22  ;;  %v390_v30 = vand.u32 65535, %v1007_v27  ;;  %v391_v38 = vshrl.u32 %v1007_v27, 16  ;;  %v415_v47 = vshrl.u32 %v384_v17, 16 }
  0x4a   :  { %v288_v11 = vshll.u32 %v988_v56, 30  ;;  %v392_v40 = vand.u32 65535, %v388_v26  ;;  %v393_v23 = vshrl.u32 %v388_v26, 16  ;;  %v144_v50 = vshll.u32 %v942_v15, %v142_v18 }
  0x4b   :  { %v145_v51 = vshrl.u32 %v127_v9, %v143_v34  ;;  %v149_v55 = vshll.u32 %v148_v44, 23  ;;  %v281_v46 = vadd.s32 %v947_v25, %v954_v36  ;;  %v417_v58 = vmul.u32 %v415_v47, %v390_v30 }
  0x4c   :  { %v289_v20 = vsub.s32 %v285_v53, %v288_v11  ;;  %v394_v59 = vmul.u32 %v392_v40, %v390_v30  ;;  %v395_v45 = vmul.u32 %v393_v23, %v390_v30  ;;  %v396_v49 = vmul.u32 %v392_v40, %v391_v38 }
  0x4d   :  { %v397_v41 = vmul.u32 %v393_v23, %v391_v38  ;;  %v414_v53 = vand.u32 65535, %v384_v17  ;;  %v146_v10 = vor.u32 %v145_v51, %v144_v50  ;;  %v150_v15 = vor.u32 4788187, %v149_v55 }
  0x4e   :  { %vm290_vm11 = vcmp.lt.s32.totalorder %v289_v20, 0  ;;  %v291_v24 = vsub.s32 0, %v289_v20  ;;  %v398_v52 = vshll.u32 %v395_v45, 16  ;;  %v400_v62 = vshll.u32 %v396_v49, 16 }
  0x4f   :  { %v418_v12 = vmul.u32 %v414_v53, %v391_v38  ;;  %v416_v13 = vmul.u32 %v414_v53, %v390_v30  ;;  %v420_v36 = vshll.u32 %v417_v58, 16  ;;  %v153_v9 = vcvt.s32.f32 %v146_v10 }
  0x50   :  { %v292_v7 = vsel %vm290_vm11, %v291_v24, %v289_v20  ;;  %vm402_vm13 = vc.u32 %v394_v59, %v398_v52  ;;  %v404_v2 = vadd.s32 %v398_v52, %v394_v59  ;;  %v399_v17 = vshrl.u32 %v395_v45, 16 }
  0x51   :  { %v293_v16 = vclz %v292_v7  ;;  %v403_v63 = vsel %vm402_vm13, 1, %v775_v54  ;;  %v419_v24 = vmul.u32 %v415_v47, %v391_v38  ;;  %v151_v26 = vand.u32 2147483647, %v150_v15 }
  0x52   :  { %v405_v11 = vadd.s32 %v403_v63, %v397_v41  ;;  %vm406_vm14 = vc.u32 %v404_v2, %v400_v62  ;;  %v422_v23 = vshll.u32 %v418_v12, 16  ;;  %v1027_v44 = vmul.f32 0.62831855, %v1023_v14 }
  0x53   :  { %v692_v29 = vadd.s32 4294967294, %v293_v16  ;;  %v407_v22 = vsel %vm406_vm14, 1, %v775_v54  ;;  %v378_v30 = vsel %vm376_vm9, %v983_v42, 2102212464  ;;  %vm424_vm15 = vc.u32 %v416_v13, %v420_v36 }
  0x54   :  { %v409_v40 = vadd.s32 %v407_v22, %v405_v11  ;;  %v425_v59 = vsel %vm424_vm15, 1, %v775_v54  ;;  %v426_v38 = vadd.s32 %v420_v36, %v416_v13  ;;  %v401_v45 = vshrl.u32 %v396_v49, 16 }
  0x55   :  { %vm693_vm12 = vcmp.lt.s32.totalorder %v692_v29, 0  ;;  %v427_v50 = vadd.s32 %v425_v59, %v419_v24  ;;  %v154_v51 = vmul.f32 %v153_v9, %v151_v26  ;;  %v379_v42 = vsel %vm375_vm8, %v981_v1, %v378_v30 }
  0x56   :  { %v296_v60 = vsel %vm693_vm12, 0, %v692_v29  ;;  %v410_v47 = vadd.s32 %v409_v40, %v399_v17  ;;  %v421_v29 = vshrl.u32 %v417_v58, 16  ;;  %vm428_vm0 = vc.u32 %v426_v38, %v422_v23 }
  0x57   :  { %v297_v28 = vsub.s32 32, %v296_v60  ;;  %v301_v18 = vsub.s32 4294967266, %v296_v60  ;;  %v298_v19 = vshll.u32 %v289_v20, %v296_v60  ;;  %v357_v20 = vshrl.u32 %v769_v31, %v951_v32 }
  0x58   :  { %v429_v52 = vsel %vm428_vm0, 1, %v775_v54  ;;  %v498_v55 = vand.u32 2139095040, %v1027_v44  ;;  %v423_v49 = vshrl.u32 %v418_v12, 16  ;;  %v1043_v60 = vadd.s32 %v410_v47, %v401_v45 }
  0x59   :  { %v299_v21 = vshrl.u32 %v281_v46, %v297_v28  ;;  %v302_v25 = vadd.s32 127, %v301_v18  ;;  %v377_v32 = vsel %vm373_vm7, %v357_v20, %v979_v61  ;;  %v431_v46 = vadd.s32 %v429_v52, %v427_v50 }
  0x5a   :  { %v1045_v58 = vadd.s32 %v426_v38, %v422_v23  ;;  %v499_v62 = vshrl.u32 %v498_v55, 23  ;;  %v155_v63 = vxor.u32 2147483648, %v154_v51  ;;  %v380_v61 = vsel %vm374_vm10, %v377_v32, %v379_v42 }
  0x5b   :  { %v303_v34 = vshll.u32 %v302_v25, 23  ;;  %v300_v7 = vor.u32 %v299_v21, %v298_v19  ;;  %v432_v2 = vadd.s32 %v431_v46, %v421_v29  ;;  %vm35_vm1 = vcmp.lt.s32.totalorder %v793_v3, 0 }
  0x5c   :  { %v697_v1 = vadd.s32 4294967169, %v499_v62  ;;  %v434_v15 = vmul.u32 %v1007_v27, %v380_v61  ;;  %vm436_vm2 = vc.u32 %v1043_v60, %v1045_v58  ;;  %vm1055_vm3 = vcmp.le.f32.partialorder %v33_v6, 0.7853982 }
  0x5d   :  { %v304_v16 = vor.u32 4788187, %v303_v34  ;;  %v307_v53 = vcvt.s32.f32 %v300_v7  ;;  %v433_v28 = vadd.s32 %v432_v2, %v423_v49  ;;  %v156_v57 = vsel %vm35_vm1, %v155_v63, %v154_v51 }
  0x5e   :  { %v505_v18 = vadd.s32 1, %v697_v1  ;;  %vm189_vm5 = vcmp.lt.s32.totalorder %v795_v4, 0  ;;  %v1065_v21 = vsel %vm1055_vm3, %v793_v3, %v156_v57  ;;  %v495_v6 = vand.u32 2147483647, %v1027_v44 }
  0x5f   :  { %v305_v41 = vand.u32 2147483647, %v304_v16  ;;  %v437_v12 = vadd.s32 1, %v433_v28  ;;  %v1070_v22 = vmul.f32 %v1065_v21, %v1065_v21  ;;  %vm1074_vm6 = vcmp.le.f32.partialorder %v187_v8, 0.7853982 }
  0x60   :  { %vm506_vm4 = vcmp.gt.s32.totalorder %v505_v18, 0  ;;  %v502_v40 = vand.u32 8388607, %v495_v6  ;;  %vm343_vm13 = vcmp.lt.s32.totalorder %v797_v5, 0 }
  0x61   :  { %v308_v10 = vmul.f32 %v307_v53, %v305_v41  ;;  %v438_v13 = vsel %vm436_vm2, %v437_v12, %v433_v28  ;;  %v507_v27 = vsel %vm506_vm4, %v505_v18, 0  ;;  %v162_v47 = vmul.f32 -0.001358992, %v1070_v22 }
  0x62   :  { %v439_v25 = vadd.s32 %v438_v13, %v434_v15  ;;  %v509_v36 = vand.u32 31, %v507_v27  ;;  %v1096_v45 = vshrl.u32 %v507_v27, 5  ;;  %v503_v29 = vor.u32 8388608, %v502_v40 }
  0x63   :  { %v309_v19 = vxor.u32 2147483648, %v308_v10  ;;  %v1121_v1 = vadd.f32 0.041655596, %v162_v47  ;;  %v435_v13 = vadd.s32 %v1045_v58, %v1043_v60  ;;  %vm1160_vm4 = vcmp.le.f32.partialorder %v341_v43, 0.7853982 }
  0x64   :  { %v440_v9 = vadd.s32 536870912, %v439_v25  ;;  %v510_v17 = vsub.s32 32, %v509_v36  ;;  %v512_v23 = vshll.u32 %v769_v31, %v509_v36  ;;  %v515_v20 = vshll.u32 %v770_v33, %v509_v36 }
  0x65   :  { %v310_v26 = vsel %vm189_vm5, %v309_v19, %v308_v10  ;;  %v521_v8 = vshll.u32 %v772_v37, %v509_v36  ;;  %v518_v50 = vshll.u32 %v771_v35, %v509_v36  ;;  %v524_v32 = vshll.u32 %v773_v39, %v509_v36 }
  0x66   :  { %v1080_v34 = vshrl.u32 %v440_v9, 30  ;;  %v513_v30 = vshrl.u32 %v770_v33, %v510_v17  ;;  %v516_v7 = vshrl.u32 %v771_v35, %v510_v17  ;;  %v522_v16 = vshrl.u32 %v773_v39, %v510_v17 }
  0x67   :  { %v1093_v59 = vsel %vm1074_vm6, %v795_v4, %v310_v26  ;;  %v519_v33 = vshrl.u32 %v772_v37, %v510_v17  ;;  %v525_v42 = vshrl.u32 %v774_v48, %v510_v17  ;;  %vm527_vm8 = vcmp.lt.s32.totalorder %v1096_v45, 1 }
  0x68   :  { %v442_v38 = vshll.u32 %v1080_v34, 30  ;;  %v1105_v52 = vmul.f32 %v1093_v59, %v1093_v59  ;;  %v514_v55 = vor.u32 %v513_v30, %v512_v23  ;;  %v1107_v41 = vor.u32 %v516_v7, %v515_v20 }
  0x69   :  { %v523_v53 = vor.u32 %v522_v16, %v521_v8  ;;  %v526_v46 = vor.u32 %v525_v42, %v524_v32  ;;  %v169_v35 = vmul.f32 -0.00019511016, %v1070_v22  ;;  %v520_v37 = vor.u32 %v519_v33, %v518_v50 }
  0x6a   :  { %v443_v51 = vsub.s32 %v439_v25, %v442_v38  ;;  %vm530_vm9 = vcmp.lt.s32.totalorder %v1096_v45, 4  ;;  %v157_v39 = vsub.s32 4, %v936_v0  ;;  %vm529_vm10 = vcmp.lt.s32.totalorder %v1096_v45, 3 }
  0x6b   :  { %v1114_v62 = vshll.u32 %v503_v29, 8  ;;  %v323_v63 = vmul.f32 -0.00019511016, %v1105_v52  ;;  %vm528_vm11 = vcmp.lt.s32.totalorder %v1096_v45, 2  ;;  %v535_v2 = vsel %vm527_vm8, %v514_v55, %v1107_v41 }
  0x6c   :  { %vm444_vm7 = vcmp.lt.s32.totalorder %v443_v51, 0  ;;  %v445_v49 = vsub.s32 0, %v443_v51  ;;  %v536_v10 = vsel %vm530_vm9, %v523_v53, 920167782  ;;  %v540_v28 = vsel %vm530_vm9, %v526_v46, 1326507024 }
  0x6d   :  { %v170_v15 = vadd.f32 0.008332121, %v169_v35  ;;  %v537_v57 = vsel %vm529_vm10, %v520_v37, %v536_v10  ;;  %v539_v12 = vsel %vm527_vm8, %v1107_v41, %v520_v37  ;;  %v316_v19 = vmul.f32 -0.001358992, %v1105_v52 }
  0x6e   :  { %v446_v48 = vsel %vm444_vm7, %v445_v49, %v443_v51  ;;  %v538_v27 = vsel %vm528_vm11, %v535_v2, %v537_v57  ;;  %v541_v25 = vsel %vm529_vm10, %v523_v53, %v540_v28  ;;  %v324_v36 = vadd.f32 0.008332121, %v323_v63 }
  0x6f   :  { %v447_v61 = vclz %v446_v48  ;;  %v544_v9 = vand.u32 65535, %v1114_v62  ;;  %v545_v26 = vshrl.u32 %v1114_v62, 16  ;;  %v511_v23 = vshrl.u32 %v769_v31, %v510_v17 }
  0x70   :  { %v542_v20 = vsel %vm528_vm11, %v539_v12, %v541_v25  ;;  %v569_v30 = vshrl.u32 %v538_v27, 16  ;;  %v568_v8 = vand.u32 65535, %v538_v27  ;;  %v171_v16 = vmul.f32 %v170_v15, %v1070_v22 }
  0x71   :  { %v695_v18 = vadd.s32 4294967294, %v447_v61  ;;  %v317_v38 = vadd.f32 0.041655596, %v316_v19  ;;  %v546_v47 = vand.u32 65535, %v542_v20  ;;  %v547_v50 = vshrl.u32 %v542_v20, 16 }
  0x72   :  { %v325_v33 = vmul.f32 %v324_v36, %v1105_v52  ;;  %v571_v42 = vmul.u32 %v569_v30, %v544_v9  ;;  %v531_v31 = vsel %vm527_vm8, %v511_v23, %v514_v55  ;;  %v570_v35 = vmul.u32 %v568_v8, %v544_v9 }
  0x73   :  { %vm696_vm12 = vcmp.lt.s32.totalorder %v695_v18, 0  ;;  %v548_v17 = vmul.u32 %v546_v47, %v544_v9  ;;  %v549_v53 = vmul.u32 %v547_v50, %v544_v9  ;;  %v572_v48 = vmul.u32 %v568_v8, %v545_v26 }
  0x74   :  { %v450_v40 = vsel %vm696_vm12, 0, %v695_v18  ;;  %v532_v63 = vsel %vm530_vm9, %v520_v37, 2102212464  ;;  %v551_v61 = vmul.u32 %v547_v50, %v545_v26  ;;  %v573_v18 = vmul.u32 %v569_v30, %v545_v26 }
  0x75   :  { %v451_v60 = vsub.s32 32, %v450_v40  ;;  %v452_v58 = vshll.u32 %v443_v51, %v450_v40  ;;  %v455_v7 = vsub.s32 4294967266, %v450_v40  ;;  %v550_v51 = vmul.u32 %v546_v47, %v545_v26 }
  0x76   :  { %v552_v2 = vshll.u32 %v549_v53, 16  ;;  %v574_v57 = vshll.u32 %v571_v42, 16  ;;  %v553_v12 = vshrl.u32 %v549_v53, 16  ;;  %v576_v19 = vshll.u32 %v572_v48, 16 }
  0x77   :  { %v453_v29 = vshrl.u32 %v435_v13, %v451_v60  ;;  %v456_v32 = vadd.s32 127, %v455_v7  ;;  %v554_v10 = vshll.u32 %v550_v51, 16  ;;  %v575_v9 = vshrl.u32 %v571_v42, 16 }
  0x78   :  { %vm556_vm14 = vc.u32 %v548_v17, %v552_v2  ;;  %v558_v55 = vadd.s32 %v552_v2, %v548_v17  ;;  %vm578_vm15 = vc.u32 %v570_v35, %v574_v57  ;;  %v580_v25 = vadd.s32 %v574_v57, %v570_v35 }
  0x79   :  { %v454_v49 = vor.u32 %v453_v29, %v452_v58  ;;  %v457_v46 = vshll.u32 %v456_v32, 23  ;;  %v557_v27 = vsel %vm556_vm14, 1, %v775_v54  ;;  %v579_v37 = vsel %vm578_vm15, 1, %v775_v54 }
  0x7a   :  { %v559_v36 = vadd.s32 %v557_v27, %v551_v61  ;;  %vm560_vm0 = vc.u32 %v558_v55, %v554_v10  ;;  %v581_v20 = vadd.s32 %v579_v37, %v573_v18  ;;  %vm582_vm2 = vc.u32 %v580_v25, %v576_v19 }
  0x7b   :  { %v458_v28 = vor.u32 4788187, %v457_v46  ;;  %v461_v15 = vcvt.s32.f32 %v454_v49  ;;  %v561_v23 = vsel %vm560_vm0, 1, %v775_v54  ;;  %v533_v26 = vsel %vm529_vm10, %v1107_v41, %v532_v63 }
  0x7c   :  { %v555_v30 = vshrl.u32 %v550_v51, 16  ;;  %v563_v60 = vadd.s32 %v561_v23, %v559_v36  ;;  %v583_v58 = vsel %vm582_vm2, 1, %v775_v54  ;;  %v577_v47 = vshrl.u32 %v572_v48, 16 }
  0x7d   :  { %v459_v13 = vand.u32 2147483647, %v458_v28  ;;  %v585_v50 = vadd.s32 %v583_v58, %v581_v20  ;;  %v164_v29 = vmul.f32 %v1121_v1, %v1070_v22  ;;  %v1166_v42 = vadd.s32 %v580_v25, %v576_v19 }
  0x7e   :  { %v564_v32 = vadd.s32 %v563_v60, %v553_v12  ;;  %v172_v41 = vadd.f32 -0.16666654, %v171_v16  ;;  %v534_v54 = vsel %vm528_vm11, %v531_v31, %v533_v26  ;;  %v318_v53 = vmul.f32 %v317_v38, %v1105_v52 }
  0x7f   :  { %v462_v40 = vmul.f32 %v461_v15, %v459_v13  ;;  %v586_v43 = vadd.s32 %v585_v50, %v575_v9  ;;  %v326_v51 = vadd.f32 -0.16666654, %v325_v33  ;;  %v158_v1 = vsel %vm35_vm1, %v157_v39, %v936_v0 }
  0x80   :  { %v1176_v46 = vadd.s32 %v564_v32, %v555_v30  ;;  %v165_v45 = vadd.f32 -0.4999988, %v164_v29  ;;  %v311_v31 = vsub.s32 4, %v988_v56  ;;  %v588_v38 = vmul.u32 %v1114_v62, %v534_v54 }
  0x81   :  { %v463_v8 = vxor.u32 2147483648, %v462_v40  ;;  %v587_v35 = vadd.s32 %v586_v43, %v577_v47  ;;  %v173_v33 = vmul.f32 %v172_v41, %v1070_v22  ;;  %v319_v2 = vadd.f32 -0.4999988, %v318_v53 }
  0x82   :  { %vm590_vm7 = vc.u32 %v1176_v46, %v1166_v42  ;;  %v327_v10 = vmul.f32 %v326_v51, %v1105_v52  ;;  %v465_v0 = vsub.s32 4, %v1080_v34  ;;  %v160_v18 = vsel %vm1055_vm3, 0, %v158_v1 }
  0x83   :  { %v464_v17 = vsel %vm343_vm13, %v463_v8, %v462_v40  ;;  %v591_v61 = vadd.s32 1, %v587_v35  ;;  %v166_v62 = vmul.f32 %v165_v45, %v1070_v22  ;;  %v174_v12 = vadd.f32 1.0, %v173_v33 }
  0x84   :  { %v467_v49 = vsel %vm1160_vm4, %v797_v5, %v464_v17  ;;  %v312_v55 = vsel %vm189_vm5, %v311_v31, %v988_v56  ;;  %v320_v27 = vmul.f32 %v319_v2, %v1105_v52  ;;  %v328_v25 = vadd.f32 1.0, %v327_v10 }
  0x85   :  { %v469_v16 = vmul.f32 %v467_v49, %v467_v49  ;;  %v592_v15 = vsel %vm590_vm7, %v591_v61, %v587_v35  ;;  %v466_v36 = vsel %vm343_vm13, %v465_v0, %v1080_v34  ;;  %v167_v40 = vadd.f32 1.0, %v166_v62 }
  0x86   :  { %v593_v57 = vadd.s32 %v592_v15, %v588_v38  ;;  %v177_v22 = vand.u32 3, %v160_v18  ;;  %v314_v23 = vsel %vm1074_vm6, 0, %v312_v55  ;;  %v175_v56 = vmul.f32 %v174_v12, %v1065_v21 }
  0x87   :  { %v470_v48 = vmul.f32 -0.001358992, %v469_v16  ;;  %v477_v63 = vmul.f32 -0.00019511016, %v469_v16  ;;  %v468_v52 = vsel %vm1160_vm4, 0, %v466_v36  ;;  %v321_v60 = vadd.f32 1.0, %v320_v27 }
  0x88   :  { %v594_v9 = vadd.s32 536870912, %v593_v57  ;;  %v329_v34 = vmul.f32 %v328_v25, %v1093_v59  ;;  %v331_v8 = vand.u32 3, %v314_v23  ;;  %vm179_vm1 = vcmp.eq.s32.totalorder %v177_v22, 0  ;;  %v711_v25 = vld [vmem:[#allocation2] sm:$0xff]  ;;  %v712_v36 = vld [vmem:[#allocation2 + $0x8] sm:$0xff] }
  0x89   :  { %v471_v39 = vadd.f32 0.041655596, %v470_v48  ;;  %v478_v28 = vadd.f32 0.008332121, %v477_v63  ;;  %v485_v24 = vand.u32 3, %v468_v52  ;;  %v180_v32 = vxor.u32 2147483648, %v175_v56 }
  0x8a   :  { %v1202_v20 = vshrl.u32 %v594_v9, 30  ;;  %vm182_vm3 = vcmp.eq.s32.totalorder %v177_v22, 2  ;;  %v183_v41 = vxor.u32 2147483648, %v167_v40  ;;  %v334_v17 = vxor.u32 2147483648, %v329_v34  ;;  %v713_v9 = vld [vmem:[#allocation2 + $0x10] sm:$0xff] }
  0x8b   :  { %v472_v19 = vmul.f32 %v471_v39, %v469_v16  ;;  %v479_v13 = vmul.f32 %v478_v28, %v469_v16  ;;  %v337_v7 = vxor.u32 2147483648, %v321_v60  ;;  %vm333_vm6 = vcmp.eq.s32.totalorder %v331_v8, 0 }
  0x8c   :  { %v596_v58 = vshll.u32 %v1202_v20, 30  ;;  %vm336_vm8 = vcmp.eq.s32.totalorder %v331_v8, 2  ;;  %vm487_vm9 = vcmp.eq.s32.totalorder %v485_v24, 0  ;;  %vm490_vm10 = vcmp.eq.s32.totalorder %v485_v24, 2 }
  0x8d   :  { %v473_v11 = vadd.f32 -0.4999988, %v472_v19  ;;  %v480_v37 = vadd.f32 -0.16666654, %v479_v13  ;;  %vm178_vm11 = vcmp.lt.s32.totalorder %v177_v22, 2  ;;  %vm332_vm12 = vcmp.lt.s32.totalorder %v331_v8, 2 }
  0x8e   :  { %v597_v29 = vsub.s32 %v593_v57, %v596_v58  ;;  %v181_v1 = vsel %vm179_vm1, %v167_v40, %v180_v32  ;;  %v335_v35 = vsel %vm333_vm6, %v321_v60, %v334_v17  ;;  %vm486_vm13 = vcmp.lt.s32.totalorder %v485_v24, 2 }
  0x8f   :  { %v474_v26 = vmul.f32 %v473_v11, %v469_v16  ;;  %v481_v30 = vmul.f32 %v480_v37, %v469_v16  ;;  %v184_v16 = vsel %vm182_vm3, %v183_v41, %v175_v56  ;;  %vm176_vm14 = vweird.f32 %v793_v3 }
  0x90   :  { %vm598_vm5 = vcmp.lt.s32.totalorder %v597_v29, 0  ;;  %v599_v54 = vsub.s32 0, %v597_v29  ;;  %vm330_vm15 = vweird.f32 %v795_v4  ;;  %v185_v33 = vsel %vm178_vm11, %v181_v1, %v184_v16 }
  0x91   :  { %v475_v47 = vadd.f32 1.0, %v474_v26  ;;  %v482_v50 = vadd.f32 1.0, %v481_v30  ;;  %v589_v63 = vadd.s32 %v1166_v42, %v1176_v46  ;;  %vm484_vm2 = vweird.f32 %v797_v5 }
  0x92   :  { %v600_v53 = vsel %vm598_vm5, %v599_v54, %v597_v29  ;;  %v186_v28 = vsel %vm176_vm14, nan, %v185_v33  ;;  %vm657_vm4 = vcmp.lt.f32.partialorder %v711_v25, 5.0  ;;  %vm658_vm7 = vcmp.lt.f32.partialorder %v712_v36, 5.0 }
  0x93   :  { %v483_v21 = vmul.f32 %v482_v50, %v467_v49  ;;  %v491_v59 = vxor.u32 2147483648, %v475_v47  ;;  %v601_v51 = vclz %v600_v53  ;;  %v338_v49 = vsel %vm336_vm8, %v337_v7, %v329_v34 }
  0x94   :  { %v339_v48 = vsel %vm332_vm12, %v335_v35, %v338_v49  ;;  %v649_v12 = vadd.f32 1.0, %v186_v28  ;;  %vm659_vm1 = vcmp.lt.f32.partialorder %v713_v9, 5.0  ;;  %vm497_vm3 = vcmp.lt.s32.totalorder %v1027_v44, 0 }
  0x95   :  { %v488_v43 = vxor.u32 2147483648, %v483_v21  ;;  %v492_v31 = vsel %vm490_vm10, %v491_v59, %v483_v21  ;;  %v698_v38 = vadd.s32 4294967294, %v601_v51  ;;  %v340_v15 = vsel %vm330_vm15, nan, %v339_v48 }
  0x96   :  { %v650_v55 = vadd.f32 1.0, %v340_v15  ;;  %v653_v46 = vmul.f32 0.5, %v649_v12  ;;  %vm1219_vm5 = vcmp.le.f32.partialorder %v495_v6, 0.7853982  ;;  %v619_v30 = vsub.s32 4, %v1202_v20 }
  0x97   :  { %v489_v45 = vsel %vm487_vm9, %v475_v47, %v488_v43  ;;  %vm699_vm0 = vcmp.lt.s32.totalorder %v698_v38, 0  ;;  %vm638_vm10 = vweird.f32 %v1027_v44  ;;  %vm660_vm11 = vcmp.lt.f32.partialorder %v1023_v14, 5.0 }
  0x98   :  { %v493_v61 = vsel %vm486_vm13, %v489_v45, %v492_v31  ;;  %v604_v2 = vsel %vm699_vm0, 0, %v698_v38  ;;  %v654_v27 = vmul.f32 0.5, %v650_v55  ;;  %v661_v37 = vsel %vm657_vm4, %v653_v46, 0.0 }
  0x99   :  { %v605_v10 = vsub.s32 32, %v604_v2  ;;  %v606_v0 = vshll.u32 %v597_v29, %v604_v2  ;;  %v609_v39 = vsub.s32 4294967266, %v604_v2  ;;  %v494_v18 = vsel %vm484_vm2, nan, %v493_v61  ;;  %665 = vst [vmem:[#allocation5] sm:$0xff] %v661_v37 }
  0x9a   :  { %v651_v19 = vadd.f32 1.0, %v494_v18  ;;  %v662_v40 = vsel %vm658_vm7, %v654_v27, 0.0  ;;  %v620_v47 = vsel %vm497_vm3, %v619_v30, %v1202_v20 }
  0x9b   :  { %v607_v62 = vshrl.u32 %v589_v63, %v605_v10  ;;  %v610_v3 = vadd.s32 127, %v609_v39  ;;  %666 = vst [vmem:[#allocation5 + $0x8] sm:$0xff] %v662_v40  ;;  %v622_v6 = vsel %vm1219_vm5, 0, %v620_v47 }
  0x9c   :  { %v655_v5 = vmul.f32 0.5, %v651_v19  ;;  %v639_v17 = vand.u32 3, %v622_v6 }
  0x9d   :  { %v608_v57 = vor.u32 %v607_v62, %v606_v0  ;;  %v611_v4 = vshll.u32 %v610_v3, 23 }
  0x9e   :  { %v663_v22 = vsel %vm659_vm1, %v655_v5, 0.0  ;;  %vm644_vm6 = vcmp.eq.s32.totalorder %v639_v17, 2  ;;  %vm641_vm8 = vcmp.eq.s32.totalorder %v639_v17, 0  ;;  %vm640_vm9 = vcmp.lt.s32.totalorder %v639_v17, 2 }
  0x9f   :  { %v612_v13 = vor.u32 4788187, %v611_v4  ;;  %v615_v42 = vcvt.s32.f32 %v608_v57  ;;  %667 = vst [vmem:[#allocation5 + $0x10] sm:$0xff] %v663_v22 }
  0xa1   :  { %v613_v11 = vand.u32 2147483647, %v612_v13 }
  0xa3   :  { %v616_v23 = vmul.f32 %v615_v42, %v613_v11 }
  0xa5   :  { %v617_v52 = vxor.u32 2147483648, %v616_v23 }
  0xa7   :  { %v618_v26 = vsel %vm497_vm3, %v617_v52, %v616_v23 }
  0xa8   :  { %v621_v60 = vsel %vm1219_vm5, %v1027_v44, %v618_v26 }
  0xa9   :  { %v623_v34 = vmul.f32 %v621_v60, %v621_v60 }
  0xab   :  { %v624_v58 = vmul.f32 -0.001358992, %v623_v34  ;;  %v631_v8 = vmul.f32 -0.00019511016, %v623_v34 }
  0xad   :  { %v625_v50 = vadd.f32 0.041655596, %v624_v58  ;;  %v632_v24 = vadd.f32 0.008332121, %v631_v8 }
  0xaf   :  { %v626_v29 = vmul.f32 %v625_v50, %v623_v34  ;;  %v633_v32 = vmul.f32 %v632_v24, %v623_v34 }
  0xb1   :  { %v627_v41 = vadd.f32 -0.4999988, %v626_v29  ;;  %v634_v21 = vadd.f32 -0.16666654, %v633_v32 }
  0xb3   :  { %v628_v7 = vmul.f32 %v627_v41, %v623_v34  ;;  %v635_v54 = vmul.f32 %v634_v21, %v623_v34 }
  0xb5   :  { %v629_v43 = vadd.f32 1.0, %v628_v7  ;;  %v636_v59 = vadd.f32 1.0, %v635_v54 }
  0xb7   :  { %v637_v53 = vmul.f32 %v636_v59, %v621_v60  ;;  %v645_v51 = vxor.u32 2147483648, %v629_v43 }
  0xb9   :  { %v642_v20 = vxor.u32 2147483648, %v637_v53  ;;  %v646_v1 = vsel %vm644_vm6, %v645_v51, %v637_v53 }
  0xbb   :  { %v643_v16 = vsel %vm641_vm8, %v629_v43, %v642_v20 }
  0xbc   :  { %v647_v35 = vsel %vm640_vm9, %v643_v16, %v646_v1 }
  0xbd   :  { %v648_v49 = vsel %vm638_vm10, nan, %v647_v35 }
  0xbe   :  { %v652_v45 = vadd.f32 1.0, %v648_v49 }
  0xc0   :  { %v656_v31 = vmul.f32 0.5, %v652_v45 }
  0xc2   :  { %v664_v38 = vsel %vm660_vm11, %v656_v31, 0.0 }
  0xc3   :  { %668 = vst [vmem:[#allocation5 + $0x18] sm:$0xff] %v664_v38 }
  0xc4   :  { %681 = dma.vmem_to_hbm [thread:$0]  %s674_s13, 512, %s676_s16, [#allocation4], %s767_s11, %s767_s11, %s768_s12  }
  0xc5   :  { %764 = dma.done.wait [#allocation4], 512  }
  0xc6   :  { %765 = vsyncadd [#allocation4], 4294966784 }
  0xc7   :  { %686 = vsyncpa [#allocation3], 1 }
  0xc8   :  { %687 = vsyncpa [#allocation4], 1 }

</bundles_post_ra>
